<compile_context>
chip_gen: v6e
topology: v6e:2x2x1
jax: 0.10.0
libtpu: 0.0.40
codegen_flags: <defaults>
</compile_context>

<pallas_src>
import functools

import jax
import jax.numpy as jnp
from jax import lax
from jax.experimental import pallas as pl
from jax.experimental.pallas import tpu as pltpu


def _shift(a, oh, ow, W, HW, first_col, last_col):
    """Shifted tap on a flattened spatial layout.

    a: (C, H*W) f32, row-major flattening of (C, H, W).
    Returns s with s[c, h*W + w] = a[c, (h+oh)*W + (w+ow)] if in bounds, else 0.
    oh, ow are Python ints in {-1, 0, 1} (trace-time constants).
    """
    C = a.shape[0]
    dt = a.dtype
    # H shift == shift by a whole row (W lanes) along the flattened axis.
    if oh == 1:
        a = jnp.concatenate([a[:, W:], jnp.zeros((C, W), dt)], axis=1)
    elif oh == -1:
        a = jnp.concatenate([jnp.zeros((C, W), dt), a[:, :HW - W]], axis=1)
    # W shift == shift by 1 lane, plus masking the row-edge column that would
    # otherwise pick up the neighbouring row.
    if ow == 1:
        a = jnp.concatenate([a[:, 1:], jnp.zeros((C, 1), dt)], axis=1)
        a = jnp.where(last_col, 0.0, a)
    elif ow == -1:
        a = jnp.concatenate([jnp.zeros((C, 1), dt), a[:, :HW - 1]], axis=1)
        a = jnp.where(first_col, 0.0, a)
    return a


def _resblock_kernel(x_ref, w1_ref, b1_ref, w2_ref, b2_ref, out_ref, *, H, W):
    """Fused conv3x3 -> bias -> ReLU -> conv3x3 -> bias -> +x for one image.

    x_ref  : (1, C, H*W)  input block (also the residual)
    w1_ref : (C, 9*C)     conv1 weights, K ordered (kh, kw, cin)
    b1_ref : (C, 1)       conv1 bias
    w2_ref : (C, 9*C)     conv2 weights
    b2_ref : (C, 1)       conv2 bias
    out_ref: (1, C, H*W)  output block (lane-dense: last dim = H*W)
    """
    C = x_ref.shape[1]
    HW = H * W
    cdt = w1_ref.dtype  # matmul compute dtype (f32 or bf16); accumulation is f32

    x = x_ref[0]  # (C, HW) f32 -- single DMA; reused as residual below.

    # Row-edge masks for the W-direction taps (computed once, reused by both convs).
    w_idx = lax.broadcasted_iota(jnp.int32, (C, HW), 1) % W
    first_col = w_idx == 0
    last_col = w_idx == (W - 1)

    def im2col(a):
        taps = []
        for kh in range(3):
            for kw in range(3):
                taps.append(_shift(a, kh - 1, kw - 1, W, HW, first_col, last_col))
        return jnp.concatenate(taps, axis=0).astype(cdt)  # (9C, HW)

    # conv1 + bias + ReLU: one (C, 9C) @ (9C, HW) MXU dot, f32 accumulate.
    y = jnp.dot(w1_ref[...], im2col(x), preferred_element_type=jnp.float32)
    y = jnp.maximum(y + b1_ref[...], 0.0)

    # conv2 + bias + residual add (residual read from the same input block).
    z = jnp.dot(w2_ref[...], im2col(y), preferred_element_type=jnp.float32)
    out_ref[0] = (z + b2_ref[...] + x).astype(out_ref.dtype)


def resblock_pallas(x_nchw, w1, b1, w2, b2, *, compute_dtype=jnp.float32):
    """ResBlock forward.

    x_nchw : (N, C, H, W) float32 (PyTorch layout, used directly -- no transpose)
    w1, w2 : (C, C, 3, 3) PyTorch Conv2d weights
    b1, b2 : (C,)         PyTorch Conv2d biases
    compute_dtype: dtype of the matmul inputs (use jnp.bfloat16 on v6e/v7x for
                   2x MXU throughput; accumulation stays f32 either way).
    """
    N, C, H, W = x_nchw.shape
    HW = H * W

    # Free reshape: contiguous NCHW -> (N, C, H*W), no transpose, no pad.
    x_flat = x_nchw.reshape(N, C, HW)

    # (Cout, Cin, kh, kw) -> (Cout, 9*Cin) with K ordered (kh, kw, cin) to match
    # the im2col row order in the kernel. Tiny, one-time repack.
    def to_mat(w):
        co, ci = w.shape[0], w.shape[1]
        return jnp.transpose(w, (0, 2, 3, 1)).reshape(co, 9 * ci).astype(compute_dtype)

    w1m, w2m = to_mat(w1), to_mat(w2)
    b1r = b1.reshape(C, 1).astype(jnp.float32)
    b2r = b2.reshape(C, 1).astype(jnp.float32)

    kernel = functools.partial(_resblock_kernel, H=H, W=W)

    out = pl.pallas_call(
        kernel,
        out_shape=jax.ShapeDtypeStruct((N, C, HW), x_nchw.dtype),
        grid_spec=pltpu.PrefetchScalarGridSpec(
            num_scalar_prefetch=0,
            grid=(N,),
            in_specs=[
                pl.BlockSpec((1, C, HW), lambda n: (n, 0, 0)),   # input (+ residual)
                pl.BlockSpec((C, 9 * C), lambda n: (0, 0)),      # conv1 weights
                pl.BlockSpec((C, 1), lambda n: (0, 0)),          # conv1 bias
                pl.BlockSpec((C, 9 * C), lambda n: (0, 0)),      # conv2 weights
                pl.BlockSpec((C, 1), lambda n: (0, 0)),          # conv2 bias
            ],
            out_specs=pl.BlockSpec((1, C, HW), lambda n: (n, 0, 0)),
        ),
        compiler_params=pltpu.CompilerParams(
            dimension_semantics=("parallel",)),
    )(x_flat, w1m, b1r, w2m, b2r)

    # Free reshape back to NCHW.
    return out.reshape(N, C, H, W)


def _resblock_reference(x, w1, b1, w2, b2):
    """Pure-JAX reference matching the PyTorch module semantics (NCHW / OIHW)."""
    dn = ('NCHW', 'OIHW', 'NCHW')
    y = lax.conv_general_dilated(x, w1, (1, 1), 'SAME', dimension_numbers=dn)
    y = jnp.maximum(y + b1[None, :, None, None], 0.0)
    y = lax.conv_general_dilated(y, w2, (1, 1), 'SAME', dimension_numbers=dn)
    return y + b2[None, :, None, None] + x


if __name__ == "__main__":
    key = jax.random.PRNGKey(0)
    k_x, k_w1, k_b1, k_w2, k_b2 = jax.random.split(key, 5)

    N, C, H, W = 2, 4, 16, 16
    x = jax.random.normal(k_x, (N, C, H, W), dtype=jnp.float32)

    # PyTorch Conv2d(C, C, 3, padding=1) parameter shapes: weight (C, C, 3, 3), bias (C,)
    w1 = jax.random.normal(k_w1, (C, C, 3, 3), dtype=jnp.float32) * 0.1
    b1 = jax.random.normal(k_b1, (C,), dtype=jnp.float32) * 0.1
    w2 = jax.random.normal(k_w2, (C, C, 3, 3), dtype=jnp.float32) * 0.1
    b2 = jax.random.normal(k_b2, (C,), dtype=jnp.float32) * 0.1

    out = resblock_pallas(x, w1, b1, w2, b2)
    out = jax.block_until_ready(out)

    ref = _resblock_reference(x, w1, b1, w2, b2)
    assert out.shape == (N, C, H, W)
    assert jnp.allclose(out, ref, atol=1e-4, rtol=1e-4), "mismatch vs reference"

    print("KERNEL_OK")
</pallas_src>

<mosaic_0001>
module attributes {stable_mosaic.version = 11 : i64} {
  func.func @_resblock_kernel(%arg0: i32, %arg1: memref<1x4x256xf32, #tpu.memory_space<vmem>>, %arg2: memref<4x36xf32, #tpu.memory_space<vmem>>, %arg3: memref<4x1xf32, #tpu.memory_space<vmem>>, %arg4: memref<4x36xf32, #tpu.memory_space<vmem>>, %arg5: memref<4x1xf32, #tpu.memory_space<vmem>>, %arg6: memref<1x4x256xf32, #tpu.memory_space<vmem>>) attributes {dimension_semantics = [#tpu.dimension_semantics<parallel>], iteration_bounds = array<i64: 2>, scalar_prefetch = 0 : i64, scratch_operands = 0 : i64, tpu.core_type = #tpu.core_type<tc>, window_params = [{transform_indices = @transform_0, window_bounds = array<i64: 1, 4, 256>}, {pipeline_mode = #tpu.pipeline_mode<synchronous>, transform_indices = @transform_1, window_bounds = array<i64: 4, 36>}, {pipeline_mode = #tpu.pipeline_mode<synchronous>, transform_indices = @transform_2, window_bounds = array<i64: 4, 1>}, {pipeline_mode = #tpu.pipeline_mode<synchronous>, transform_indices = @transform_3, window_bounds = array<i64: 4, 36>}, {pipeline_mode = #tpu.pipeline_mode<synchronous>, transform_indices = @transform_4, window_bounds = array<i64: 4, 1>}, {transform_indices = @transform_5, window_bounds = array<i64: 1, 4, 256>}]} {
    %c0 = arith.constant 0 : index
    %c0_0 = arith.constant 0 : index
    %c0_1 = arith.constant 0 : index
    %0 = vector.load %arg1[%c0, %c0_0, %c0_1] : memref<1x4x256xf32, #tpu.memory_space<vmem>>, vector<1x4x256xf32>
    %1 = vector.shape_cast %0 : vector<1x4x256xf32> to vector<4x256xf32>
    %2 = tpu.iota {dimensions = array<i32: 1>} : vector<4x256xi32>
    %c16_i32 = arith.constant 16 : i32
    %c0_i32 = arith.constant 0 : i32
    %3 = arith.cmpi eq, %c16_i32, %c0_i32 : i32
    %c1_i32 = arith.constant 1 : i32
    %4 = arith.select %3, %c1_i32, %c16_i32 : i32
    %5 = vector.broadcast %4 : i32 to vector<4x256xi32>
    %6 = arith.remsi %2, %5 : vector<4x256xi32>
    %c0_i32_2 = arith.constant 0 : i32
    %7 = vector.broadcast %c0_i32_2 : i32 to vector<4x256xi32>
    %8 = arith.cmpi ne, %6, %7 : vector<4x256xi32>
    %c0_i32_3 = arith.constant 0 : i32
    %9 = vector.broadcast %c0_i32_3 : i32 to vector<4x256xi32>
    %10 = arith.cmpi slt, %6, %9 : vector<4x256xi32>
    %c0_i32_4 = arith.constant 0 : i32
    %11 = arith.cmpi slt, %4, %c0_i32_4 : i32
    %12 = vector.broadcast %11 : i1 to vector<4x256xi1>
    %13 = vector.broadcast %12 : vector<4x256xi1> to vector<4x256xi1>
    %14 = arith.xori %10, %13 : vector<4x256xi1>
    %15 = arith.andi %14, %8 : vector<4x256xi1>
    %16 = vector.broadcast %4 : i32 to vector<4x256xi32>
    %17 = arith.addi %6, %16 : vector<4x256xi32>
    %18 = arith.select %15, %17, %6 : vector<4x256xi1>, vector<4x256xi32>
    %c0_i32_5 = arith.constant 0 : i32
    %19 = vector.broadcast %c0_i32_5 : i32 to vector<4x256xi32>
    %20 = arith.cmpi eq, %18, %19 : vector<4x256xi32>
    %c15_i32 = arith.constant 15 : i32
    %21 = vector.broadcast %c15_i32 : i32 to vector<4x256xi32>
    %22 = arith.cmpi eq, %18, %21 : vector<4x256xi32>
    %c0_6 = arith.constant 0 : index
    %c0_7 = arith.constant 0 : index
    %23 = vector.load %arg2[%c0_6, %c0_7] : memref<4x36xf32, #tpu.memory_space<vmem>>, vector<4x36xf32>
    %cst = arith.constant 0.000000e+00 : f32
    %24 = vector.broadcast %cst : f32 to vector<4x16xf32>
    %25 = vector.extract_strided_slice %1 {offsets = [0, 0], sizes = [4, 240], strides = [1, 1]} : vector<4x256xf32> to vector<4x240xf32>
    %26 = tpu.concatenate %24, %25 in 1 : vector<4x16xf32>, vector<4x240xf32> -> vector<4x256xf32>
    %cst_8 = arith.constant 0.000000e+00 : f32
    %27 = vector.broadcast %cst_8 : f32 to vector<4x1xf32>
    %28 = vector.extract_strided_slice %26 {offsets = [0, 0], sizes = [4, 255], strides = [1, 1]} : vector<4x256xf32> to vector<4x255xf32>
    %29 = tpu.concatenate %27, %28 in 1 : vector<4x1xf32>, vector<4x255xf32> -> vector<4x256xf32>
    %cst_9 = arith.constant 0.000000e+00 : f32
    %30 = vector.broadcast %cst_9 : f32 to vector<4x256xf32>
    %31 = arith.select %20, %30, %29 : vector<4x256xi1>, vector<4x256xf32>
    %cst_10 = arith.constant 0.000000e+00 : f32
    %32 = vector.broadcast %cst_10 : f32 to vector<4x16xf32>
    %33 = vector.extract_strided_slice %1 {offsets = [0, 0], sizes = [4, 240], strides = [1, 1]} : vector<4x256xf32> to vector<4x240xf32>
    %34 = tpu.concatenate %32, %33 in 1 : vector<4x16xf32>, vector<4x240xf32> -> vector<4x256xf32>
    %cst_11 = arith.constant 0.000000e+00 : f32
    %35 = vector.broadcast %cst_11 : f32 to vector<4x16xf32>
    %36 = vector.extract_strided_slice %1 {offsets = [0, 0], sizes = [4, 240], strides = [1, 1]} : vector<4x256xf32> to vector<4x240xf32>
    %37 = tpu.concatenate %35, %36 in 1 : vector<4x16xf32>, vector<4x240xf32> -> vector<4x256xf32>
    %38 = vector.extract_strided_slice %37 {offsets = [0, 1], sizes = [4, 255], strides = [1, 1]} : vector<4x256xf32> to vector<4x255xf32>
    %cst_12 = arith.constant 0.000000e+00 : f32
    %39 = vector.broadcast %cst_12 : f32 to vector<4x1xf32>
    %40 = tpu.concatenate %38, %39 in 1 : vector<4x255xf32>, vector<4x1xf32> -> vector<4x256xf32>
    %cst_13 = arith.constant 0.000000e+00 : f32
    %41 = vector.broadcast %cst_13 : f32 to vector<4x256xf32>
    %42 = arith.select %22, %41, %40 : vector<4x256xi1>, vector<4x256xf32>
    %cst_14 = arith.constant 0.000000e+00 : f32
    %43 = vector.broadcast %cst_14 : f32 to vector<4x1xf32>
    %44 = vector.extract_strided_slice %1 {offsets = [0, 0], sizes = [4, 255], strides = [1, 1]} : vector<4x256xf32> to vector<4x255xf32>
    %45 = tpu.concatenate %43, %44 in 1 : vector<4x1xf32>, vector<4x255xf32> -> vector<4x256xf32>
    %cst_15 = arith.constant 0.000000e+00 : f32
    %46 = vector.broadcast %cst_15 : f32 to vector<4x256xf32>
    %47 = arith.select %20, %46, %45 : vector<4x256xi1>, vector<4x256xf32>
    %48 = vector.extract_strided_slice %1 {offsets = [0, 1], sizes = [4, 255], strides = [1, 1]} : vector<4x256xf32> to vector<4x255xf32>
    %cst_16 = arith.constant 0.000000e+00 : f32
    %49 = vector.broadcast %cst_16 : f32 to vector<4x1xf32>
    %50 = tpu.concatenate %48, %49 in 1 : vector<4x255xf32>, vector<4x1xf32> -> vector<4x256xf32>
    %cst_17 = arith.constant 0.000000e+00 : f32
    %51 = vector.broadcast %cst_17 : f32 to vector<4x256xf32>
    %52 = arith.select %22, %51, %50 : vector<4x256xi1>, vector<4x256xf32>
    %53 = vector.extract_strided_slice %1 {offsets = [0, 16], sizes = [4, 240], strides = [1, 1]} : vector<4x256xf32> to vector<4x240xf32>
    %cst_18 = arith.constant 0.000000e+00 : f32
    %54 = vector.broadcast %cst_18 : f32 to vector<4x16xf32>
    %55 = tpu.concatenate %53, %54 in 1 : vector<4x240xf32>, vector<4x16xf32> -> vector<4x256xf32>
    %cst_19 = arith.constant 0.000000e+00 : f32
    %56 = vector.broadcast %cst_19 : f32 to vector<4x1xf32>
    %57 = vector.extract_strided_slice %55 {offsets = [0, 0], sizes = [4, 255], strides = [1, 1]} : vector<4x256xf32> to vector<4x255xf32>
    %58 = tpu.concatenate %56, %57 in 1 : vector<4x1xf32>, vector<4x255xf32> -> vector<4x256xf32>
    %cst_20 = arith.constant 0.000000e+00 : f32
    %59 = vector.broadcast %cst_20 : f32 to vector<4x256xf32>
    %60 = arith.select %20, %59, %58 : vector<4x256xi1>, vector<4x256xf32>
    %61 = vector.extract_strided_slice %1 {offsets = [0, 16], sizes = [4, 240], strides = [1, 1]} : vector<4x256xf32> to vector<4x240xf32>
    %cst_21 = arith.constant 0.000000e+00 : f32
    %62 = vector.broadcast %cst_21 : f32 to vector<4x16xf32>
    %63 = tpu.concatenate %61, %62 in 1 : vector<4x240xf32>, vector<4x16xf32> -> vector<4x256xf32>
    %64 = vector.extract_strided_slice %1 {offsets = [0, 16], sizes = [4, 240], strides = [1, 1]} : vector<4x256xf32> to vector<4x240xf32>
    %cst_22 = arith.constant 0.000000e+00 : f32
    %65 = vector.broadcast %cst_22 : f32 to vector<4x16xf32>
    %66 = tpu.concatenate %64, %65 in 1 : vector<4x240xf32>, vector<4x16xf32> -> vector<4x256xf32>
    %67 = vector.extract_strided_slice %66 {offsets = [0, 1], sizes = [4, 255], strides = [1, 1]} : vector<4x256xf32> to vector<4x255xf32>
    %cst_23 = arith.constant 0.000000e+00 : f32
    %68 = vector.broadcast %cst_23 : f32 to vector<4x1xf32>
    %69 = tpu.concatenate %67, %68 in 1 : vector<4x255xf32>, vector<4x1xf32> -> vector<4x256xf32>
    %cst_24 = arith.constant 0.000000e+00 : f32
    %70 = vector.broadcast %cst_24 : f32 to vector<4x256xf32>
    %71 = arith.select %22, %70, %69 : vector<4x256xi1>, vector<4x256xf32>
    %72 = tpu.concatenate %31, %34, %42, %47, %1, %52, %60, %63, %71 in 0 : vector<4x256xf32>, vector<4x256xf32>, vector<4x256xf32>, vector<4x256xf32>, vector<4x256xf32>, vector<4x256xf32>, vector<4x256xf32>, vector<4x256xf32>, vector<4x256xf32> -> vector<36x256xf32>
    %cst_25 = arith.constant dense<0.000000e+00> : vector<4x256xf32>
    %73 = tpu.matmul %23, %72, %cst_25 {dimension_numbers = #tpu.dot_dimension_numbers<[1], [0], [0], [1], [0, 0, 1, 1], [], []>} : vector<4x36xf32>, vector<36x256xf32>, vector<4x256xf32> -> vector<4x256xf32>
    %c0_26 = arith.constant 0 : index
    %c0_27 = arith.constant 0 : index
    %74 = vector.load %arg3[%c0_26, %c0_27] : memref<4x1xf32, #tpu.memory_space<vmem>>, vector<4x1xf32>
    %75 = vector.broadcast %74 : vector<4x1xf32> to vector<4x256xf32>
    %76 = arith.addf %73, %75 : vector<4x256xf32>
    %cst_28 = arith.constant 0.000000e+00 : f32
    %77 = vector.broadcast %cst_28 : f32 to vector<4x256xf32>
    %78 = arith.maximumf %76, %77 : vector<4x256xf32>
    %c0_29 = arith.constant 0 : index
    %c0_30 = arith.constant 0 : index
    %79 = vector.load %arg4[%c0_29, %c0_30] : memref<4x36xf32, #tpu.memory_space<vmem>>, vector<4x36xf32>
    %cst_31 = arith.constant 0.000000e+00 : f32
    %80 = vector.broadcast %cst_31 : f32 to vector<4x16xf32>
    %81 = vector.extract_strided_slice %78 {offsets = [0, 0], sizes = [4, 240], strides = [1, 1]} : vector<4x256xf32> to vector<4x240xf32>
    %82 = tpu.concatenate %80, %81 in 1 : vector<4x16xf32>, vector<4x240xf32> -> vector<4x256xf32>
    %cst_32 = arith.constant 0.000000e+00 : f32
    %83 = vector.broadcast %cst_32 : f32 to vector<4x1xf32>
    %84 = vector.extract_strided_slice %82 {offsets = [0, 0], sizes = [4, 255], strides = [1, 1]} : vector<4x256xf32> to vector<4x255xf32>
    %85 = tpu.concatenate %83, %84 in 1 : vector<4x1xf32>, vector<4x255xf32> -> vector<4x256xf32>
    %cst_33 = arith.constant 0.000000e+00 : f32
    %86 = vector.broadcast %cst_33 : f32 to vector<4x256xf32>
    %87 = arith.select %20, %86, %85 : vector<4x256xi1>, vector<4x256xf32>
    %cst_34 = arith.constant 0.000000e+00 : f32
    %88 = vector.broadcast %cst_34 : f32 to vector<4x16xf32>
    %89 = vector.extract_strided_slice %78 {offsets = [0, 0], sizes = [4, 240], strides = [1, 1]} : vector<4x256xf32> to vector<4x240xf32>
    %90 = tpu.concatenate %88, %89 in 1 : vector<4x16xf32>, vector<4x240xf32> -> vector<4x256xf32>
    %cst_35 = arith.constant 0.000000e+00 : f32
    %91 = vector.broadcast %cst_35 : f32 to vector<4x16xf32>
    %92 = vector.extract_strided_slice %78 {offsets = [0, 0], sizes = [4, 240], strides = [1, 1]} : vector<4x256xf32> to vector<4x240xf32>
    %93 = tpu.concatenate %91, %92 in 1 : vector<4x16xf32>, vector<4x240xf32> -> vector<4x256xf32>
    %94 = vector.extract_strided_slice %93 {offsets = [0, 1], sizes = [4, 255], strides = [1, 1]} : vector<4x256xf32> to vector<4x255xf32>
    %cst_36 = arith.constant 0.000000e+00 : f32
    %95 = vector.broadcast %cst_36 : f32 to vector<4x1xf32>
    %96 = tpu.concatenate %94, %95 in 1 : vector<4x255xf32>, vector<4x1xf32> -> vector<4x256xf32>
    %cst_37 = arith.constant 0.000000e+00 : f32
    %97 = vector.broadcast %cst_37 : f32 to vector<4x256xf32>
    %98 = arith.select %22, %97, %96 : vector<4x256xi1>, vector<4x256xf32>
    %cst_38 = arith.constant 0.000000e+00 : f32
    %99 = vector.broadcast %cst_38 : f32 to vector<4x1xf32>
    %100 = vector.extract_strided_slice %78 {offsets = [0, 0], sizes = [4, 255], strides = [1, 1]} : vector<4x256xf32> to vector<4x255xf32>
    %101 = tpu.concatenate %99, %100 in 1 : vector<4x1xf32>, vector<4x255xf32> -> vector<4x256xf32>
    %cst_39 = arith.constant 0.000000e+00 : f32
    %102 = vector.broadcast %cst_39 : f32 to vector<4x256xf32>
    %103 = arith.select %20, %102, %101 : vector<4x256xi1>, vector<4x256xf32>
    %104 = vector.extract_strided_slice %78 {offsets = [0, 1], sizes = [4, 255], strides = [1, 1]} : vector<4x256xf32> to vector<4x255xf32>
    %cst_40 = arith.constant 0.000000e+00 : f32
    %105 = vector.broadcast %cst_40 : f32 to vector<4x1xf32>
    %106 = tpu.concatenate %104, %105 in 1 : vector<4x255xf32>, vector<4x1xf32> -> vector<4x256xf32>
    %cst_41 = arith.constant 0.000000e+00 : f32
    %107 = vector.broadcast %cst_41 : f32 to vector<4x256xf32>
    %108 = arith.select %22, %107, %106 : vector<4x256xi1>, vector<4x256xf32>
    %109 = vector.extract_strided_slice %78 {offsets = [0, 16], sizes = [4, 240], strides = [1, 1]} : vector<4x256xf32> to vector<4x240xf32>
    %cst_42 = arith.constant 0.000000e+00 : f32
    %110 = vector.broadcast %cst_42 : f32 to vector<4x16xf32>
    %111 = tpu.concatenate %109, %110 in 1 : vector<4x240xf32>, vector<4x16xf32> -> vector<4x256xf32>
    %cst_43 = arith.constant 0.000000e+00 : f32
    %112 = vector.broadcast %cst_43 : f32 to vector<4x1xf32>
    %113 = vector.extract_strided_slice %111 {offsets = [0, 0], sizes = [4, 255], strides = [1, 1]} : vector<4x256xf32> to vector<4x255xf32>
    %114 = tpu.concatenate %112, %113 in 1 : vector<4x1xf32>, vector<4x255xf32> -> vector<4x256xf32>
    %cst_44 = arith.constant 0.000000e+00 : f32
    %115 = vector.broadcast %cst_44 : f32 to vector<4x256xf32>
    %116 = arith.select %20, %115, %114 : vector<4x256xi1>, vector<4x256xf32>
    %117 = vector.extract_strided_slice %78 {offsets = [0, 16], sizes = [4, 240], strides = [1, 1]} : vector<4x256xf32> to vector<4x240xf32>
    %cst_45 = arith.constant 0.000000e+00 : f32
    %118 = vector.broadcast %cst_45 : f32 to vector<4x16xf32>
    %119 = tpu.concatenate %117, %118 in 1 : vector<4x240xf32>, vector<4x16xf32> -> vector<4x256xf32>
    %120 = vector.extract_strided_slice %78 {offsets = [0, 16], sizes = [4, 240], strides = [1, 1]} : vector<4x256xf32> to vector<4x240xf32>
    %cst_46 = arith.constant 0.000000e+00 : f32
    %121 = vector.broadcast %cst_46 : f32 to vector<4x16xf32>
    %122 = tpu.concatenate %120, %121 in 1 : vector<4x240xf32>, vector<4x16xf32> -> vector<4x256xf32>
    %123 = vector.extract_strided_slice %122 {offsets = [0, 1], sizes = [4, 255], strides = [1, 1]} : vector<4x256xf32> to vector<4x255xf32>
    %cst_47 = arith.constant 0.000000e+00 : f32
    %124 = vector.broadcast %cst_47 : f32 to vector<4x1xf32>
    %125 = tpu.concatenate %123, %124 in 1 : vector<4x255xf32>, vector<4x1xf32> -> vector<4x256xf32>
    %cst_48 = arith.constant 0.000000e+00 : f32
    %126 = vector.broadcast %cst_48 : f32 to vector<4x256xf32>
    %127 = arith.select %22, %126, %125 : vector<4x256xi1>, vector<4x256xf32>
    %128 = tpu.concatenate %87, %90, %98, %103, %78, %108, %116, %119, %127 in 0 : vector<4x256xf32>, vector<4x256xf32>, vector<4x256xf32>, vector<4x256xf32>, vector<4x256xf32>, vector<4x256xf32>, vector<4x256xf32>, vector<4x256xf32>, vector<4x256xf32> -> vector<36x256xf32>
    %cst_49 = arith.constant dense<0.000000e+00> : vector<4x256xf32>
    %129 = tpu.matmul %79, %128, %cst_49 {dimension_numbers = #tpu.dot_dimension_numbers<[1], [0], [0], [1], [0, 0, 1, 1], [], []>} : vector<4x36xf32>, vector<36x256xf32>, vector<4x256xf32> -> vector<4x256xf32>
    %c0_50 = arith.constant 0 : index
    %c0_51 = arith.constant 0 : index
    %130 = vector.load %arg5[%c0_50, %c0_51] : memref<4x1xf32, #tpu.memory_space<vmem>>, vector<4x1xf32>
    %131 = vector.broadcast %130 : vector<4x1xf32> to vector<4x256xf32>
    %132 = arith.addf %129, %131 : vector<4x256xf32>
    %133 = arith.addf %132, %1 : vector<4x256xf32>
    %c0_52 = arith.constant 0 : index
    %c0_53 = arith.constant 0 : index
    %c0_54 = arith.constant 0 : index
    %134 = vector.load %arg6[%c0_52, %c0_53, %c0_54] : memref<1x4x256xf32, #tpu.memory_space<vmem>>, vector<1x4x256xf32>
    %135 = vector.shape_cast %134 : vector<1x4x256xf32> to vector<4x256xf32>
    %136 = vector.shape_cast %133 : vector<4x256xf32> to vector<1x4x256xf32>
    tpu.vector_store %arg6[%c0_52, %c0_53, %c0_54], %136 {strides = array<i32>} : memref<1x4x256xf32, #tpu.memory_space<vmem>>, vector<1x4x256xf32>,
    return
  }
  func.func @transform_0(%arg0: i32) -> (i32, i32, i32) {
    %c0_i32 = arith.constant 0 : i32
    %c0_i32_0 = arith.constant 0 : i32
    %c0_i32_1 = arith.constant 0 : i32
    return %arg0, %c0_i32, %c0_i32_0 : i32, i32, i32
  }
  func.func @transform_1(%arg0: i32) -> (i32, i32) {
    %c0_i32 = arith.constant 0 : i32
    %c0_i32_0 = arith.constant 0 : i32
    %c0_i32_1 = arith.constant 0 : i32
    return %c0_i32, %c0_i32_0 : i32, i32
  }
  func.func @transform_2(%arg0: i32) -> (i32, i32) {
    %c0_i32 = arith.constant 0 : i32
    %c0_i32_0 = arith.constant 0 : i32
    %c0_i32_1 = arith.constant 0 : i32
    return %c0_i32, %c0_i32_0 : i32, i32
  }
  func.func @transform_3(%arg0: i32) -> (i32, i32) {
    %c0_i32 = arith.constant 0 : i32
    %c0_i32_0 = arith.constant 0 : i32
    %c0_i32_1 = arith.constant 0 : i32
    return %c0_i32, %c0_i32_0 : i32, i32
  }
  func.func @transform_4(%arg0: i32) -> (i32, i32) {
    %c0_i32 = arith.constant 0 : i32
    %c0_i32_0 = arith.constant 0 : i32
    %c0_i32_1 = arith.constant 0 : i32
    return %c0_i32, %c0_i32_0 : i32, i32
  }
  func.func @transform_5(%arg0: i32) -> (i32, i32, i32) {
    %c0_i32 = arith.constant 0 : i32
    %c0_i32_0 = arith.constant 0 : i32
    %c0_i32_1 = arith.constant 0 : i32
    return %arg0, %c0_i32, %c0_i32_0 : i32, i32, i32
  }
}

</mosaic_0001>

<bundles_post_ra>
// kernel: tpu_custom_call.1
= control target key start
LH: loop header
LB: loop body
LE: loop exit
PB: predicated region body
PF: predicated region fallthrough
CT: control target
= control target key end

     0   :  { %10 = vsyncpa [#allocation3], 0  ;;  %s1337_s0 = inlined_call_operand.hbm [shape: f32[2,4,256], index: 0, kind: input, shape index: {}]   ;;  %s1338_s1 = inlined_call_operand.vmem [shape: f32[4,36], index: 1, kind: input, shape index: {}]   ;;  %s1339_s2 = inlined_call_operand.vmem [shape: f32[4,1], index: 2, kind: input, shape index: {}]   ;;  %s1340_s3 = inlined_call_operand.vmem [shape: f32[4,36], index: 3, kind: input, shape index: {}]   ;;  %s1341_s4 = inlined_call_operand.vmem [shape: f32[4,1], index: 4, kind: input, shape index: {}]   ;;  %s1342_s5 = inlined_call_operand.hbm [shape: f32[2,4,256], index: 5, kind: output, shape index: {}]  }
   0x1   :  { %12 = vsyncpa [#allocation3 + $0x1], 0 }
   0x2   :  { %13 = vsyncpa [#allocation4], 0 }
   0x3   :  { %15 = vsyncpa [#allocation4 + $0x1], 0  ;;  %s968_s18 = smov 0   ;;  %s970_s19 = smov 0  }
   0x4   :  { %s972_s20 = smov 0   ;;  %s974_s21 = smov 0  }
   0x5 LB: > { %s989_s22 = sadd.s32 4294967295, %s928_s21   ;;  %s760_s23 = sadd.s32 4294967294, %s928_s21   ;;  %s928_s21 = sphi %s974_s21, %s1367_s21   ;;  %s924_s20 = sphi %s972_s20, %s1366_s20   ;;  %s920_s19 = sphi %s970_s19, %s1365_s19   ;;  %s916_s18 = sphi %s968_s18, %s1364_s18  }
   0x6   : > { %s993_s24 = sadd.s32 1, %s928_s21   ;;  %s28_s25 = sadd.s32 1, %s924_s20 }
   0x7   : > { %s25_s26 = ssub.s32 %s928_s21, %s993_s24  ;;  %p35_p0 = scmp.ne.s32.totalorder %s924_s20, %s920_s19 }
   0x8   : > { %p26_p1 = scmp.eq.s32.totalorder %s25_s26, 0  ;;  %p36_p2 = scmp.eq.s32.totalorder %s928_s21, 0 }
   0x9   : > { %p41_p3 = scmp.ne.s32.totalorder %s920_s19, %s916_s18  ;;  %p42_p4 = scmp.eq.s32.totalorder %s989_s22, 0 }
   0xa   : > { %s1005_s27 = scalar_select %p26_p1, %s924_s20, %s28_s25  }
   0xb   : > { %p1007_p5 = por %p36_p2, %p35_p0  ;;  %p1011_p6 = por %p42_p4, %p41_p3 }
   0xc   : > { %p149_p7 = scmp.eq.s32.totalorder %s989_s22, 1  ;;  %p155_p8 = scmp.eq.s32.totalorder %s760_s23, 1 }
   0xd   : > { %s1346_s29 = scalar_select %p1011_p6, 1, 0 }
   0xe   : > { %p794_p10 = scmp.lt.s32.totalorder %s928_s21, 2  ;;  %p1018_p11 = por %p149_p7, %p35_p0 }
   0xf   : > { %p1022_p12 = por %p155_p8, %p41_p3  ;;  %s187_s7 = sand.u32 1, %s924_s20  }
  0x10   : > { %s1347_s30 = scalar_select %p1018_p11, 1, 0 }
  0x11   : > { %s1348_s6 = scalar_select %p1022_p12, 1, 0 }
  0x12   : > { %s780_s8 = sshll.u32 %s928_s21, 7  ;;  %s763_s9 = sshll.u32 %s187_s7, 3 }
  0x13   : > { %s1031_s12 = scalar_lea.hbm %s1337_s0, %s780_s8  ;;  %s191_s13 = scalar_lea.vmem [#allocation2], %s763_s9 }
  0x14   : > { %s199_s14 = sshll.u32 %s191_s13, 4  ;;  %p1035_p13 = pnand %p794_p10, %p1007_p5  ;;  %s1039_s14 = int_to_ptr.vmem [resolvable:$true] %s199_s14 }
  0x15   : > { %s188_s16 = scalar_lea.sflag [#allocation3], %s187_s7  ;;  %s836_s17 = scalar_lea.hbm %s1031_s12, 128 }
  0x16   : > { %p837_p2 = scmp.ne.s32.totalorder %s1031_s12, %s836_s17  ;;  %p838_p3 = pneg %p1035_p13 }
  0x17   : > { %s841_s26 = scalar_lea.hbm %s1337_s0, 256  ;;  %p842_p5 = scmp.lt.s32.totalorder %s1031_s12, %s1337_s0 }
  0x18   : > { %p839_p4 = pnand %p838_p3, %p837_p2  ;;  %p843_p8 = scmp.lt.s32.totalorder %s841_s26, %s836_s17 }
  0x1a   : > { %p840_p7 = pneg %p839_p4  ;;  %p844_p10 = por %p843_p8, %p842_p5 }
  0x1c   : > { %p845_p9 = pnand %p844_p10, %p840_p7 }
  0x1e   : > { %848 = shalt.err (!%p845_p9)
}
  0x1f   : > { %s849_s7 = scalar_lea.vmem %s1039_s14, 128  ;;  %s930_s9 = smov [#allocation2]  }
  0x20   : > { %p850_p0 = scmp.ne.s32.totalorder %s1039_s14, %s849_s7  ;;  %s854_s10 = sshll.u32 %s930_s9, 4  ;;  %s855_s10 = int_to_ptr.vmem [resolvable:$false] %s854_s10 }
  0x21   : > { %s856_s11 = scalar_lea.vmem %s855_s10, 256  ;;  %p857_p4 = scmp.lt.s32.totalorder %s1039_s14, %s855_s10 }
  0x22   : > { %p852_p1 = pnand %p850_p0, %p838_p3  ;;  %p858_p12 = scmp.lt.s32.totalorder %s856_s11, %s849_s7 }
  0x24   : > { %p853_p2 = pneg %p852_p1  ;;  %p859_p11 = por %p858_p12, %p857_p4 }
  0x26   : > { %p860_p6 = pnand %p859_p11, %p853_p2 }
  0x28   : > { %863 = shalt.err (!%p860_p6)
}
  0x29   : > { %789 = dma.hbm_to_vmem [thread:$0]  (!%p1035_p13), %s1031_s12, 128, %s1039_s14, %s188_s16  }
  0x2a   : > { %p1350_p9 = scmp.lt.s32.totalorder %s928_s21, 3  ;;  %p1351_p7 = scmp.ge.s32.totalorder %s928_s21, 1 }
  0x2c   : > { %p205_p0 = pnand %p1351_p7, %p1350_p9 }
  0x2d   : > { %s1066_s13 = sand.u32 (!%p205_p0), 1, %s920_s19   ;;  %p1352_p6 = scmp.ne.s32.totalorder (!%p205_p0), %s1346_s29, 0 }
  0x2e   : > { %208 = sbr.rel (%p205_p0) target bundleno = 972 (0x3cc), region = 40  ;;  %s767_s17 = sshll.u32 (!%p205_p0), %s1066_s13, 3 }
  0x2f   : > { %s211_s23 = scalar_lea.sflag (!%p205_p0), [#allocation3], %s1066_s13  ;;  %s214_s15 = scalar_lea.vmem (!%p205_p0), [#allocation2], %s767_s17 }
  0x33   : > { %907 = dma.done.wait (%p1352_p6), %s211_s23, 128  }
  0x34   : > { %909 = vsyncadd (%p1352_p6), %s211_s23, 4294967168  ;;  %v1076_v0 = vld [vmem:[%s214_s15] sm:$0xff]  ;;  %s931_s12 = smov 16   ;;  %s932_s14 = smov 112   ;;  %vm331_vm0 = vcmask 916480   ;;  %vm280_vm1 = vcmask 130048   ;;  %v242_v13 = vlaneseq }
  0x35   : > { %v1080_v1 = vcombine.high %v1076_v0, %v1076_v0  ;;  %276 = vrot.lane.b32.xlu1 %v1076_v0, %s931_s12  ;;  %s933_s29 = smov 127   ;;  %s934_s16 = smov 1   ;;  %v935_v10 = vmov 0.0   ;;  %v936_v11 = vmov 0   ;;  %v386_v12 = vld [vmem:[%s1339_s2] sm:$0xf] }
  0x36   : > { %466 = vmatprep.mubr.f32.mxu0 %v935_v10  ;;  %661 = vmatprep.mubr.f32.mxu1 %v935_v10  ;;  %v243_v15 = vand.u32 127, %v242_v13  ;;  %vm300_vm2 = vcmask 1039360   ;;  %vm377_vm4 = vcmask 1043456   ;;  %vm289_vm5 = vcmask 7168   ;;  %s781_s23 = sshll.u32 %s989_s22, 7  ;;  %s240_s15 = scalar_lea.vmem [#allocation5], %s767_s17 }
  0x37   : > { %329 = vrot.lane.b32.xlu0 %v1080_v1, %s932_s14  ;;  %vm392_vm9 = vcmask 293888   ;;  %s676_s25 = scalar_lea.sflag [#allocation4], %s1066_s13  ;;  %p1361_p12 = scmp.ne.s32.totalorder %s1347_s30, 0 }
  0x38   : > { %834 = vset.pattern.permute.xlu0 %v936_v11  ;;  %v244_v17 = vadd.s32 128, %v243_v15  ;;  %v249_v21 = vand.u32 15, %v243_v15  ;;  %s937_s22 = smov [#allocation5]  }
  0x39   : > { %278 = vrot.lane.b32.xlu1 %v1080_v1, %s931_s12  ;;  %s868_s17 = sshll.u32 %s937_s22, 4  ;;  %s869_s17 = int_to_ptr.vmem [resolvable:$false] %s868_s17 }
  0x3a   : > { %v256_v19 = vand.u32 15, %v244_v17  ;;  %vm1138_vm6 = vcmp.eq.s32.totalorder %v249_v21, 15  ;;  %vm1146_vm7 = vcmp.eq.s32.totalorder %v249_v21, 0  ;;  %s870_s28 = scalar_lea.vmem %s869_s17, 256 }
  0x3b   : > { %327 = vrot.lane.b32.xlu0 %v1076_v0, %s932_s14 }
  0x3c   : > { %vm1129_vm3 = vcmp.eq.s32.totalorder %v256_v19, 15  ;;  %vm1154_vm8 = vcmp.eq.s32.totalorder %v256_v19, 0 }
  0x3d   : > { %319 = vrot.lane.b32.xlu1 %v1080_v1, %s933_s29 }
  0x3f   : > { %307 = vrot.lane.b32.xlu0 %v1076_v0, %s934_s16 }
  0x41   : > { %317 = vrot.lane.b32.xlu1 %v1076_v0, %s933_s29 }
  0x45   : > { %309 = vrot.lane.b32.xlu1 %v1080_v1, %s934_s16 }
  0xa7   : > { %v277_v2 = vpop.permute.xlu1 %276 }
  0xa8   : > { %v1106_v5 = vsel %vm280_vm1, 0.0, %v277_v2 }
  0xa9   : > { %v330_v3 = vpop.permute.xlu0 %329 }
  0xaa   : > { %v1099_v4 = vsel %vm331_vm0, %v330_v3, 0.0 }
  0xab   : > { %338 = vrot.lane.b32.xlu1 %v1099_v4, %s934_s16  ;;  %348 = vrot.lane.b32.xlu0 %v1099_v4, %s933_s29  ;;  %v279_v7 = vpop.permute.xlu1 %278  ;;  %v374_v39 = vrot.slane %v1099_v4, 4  ;;  %v356_v4 = vrot.slane %v1106_v5, 4 }
  0xac   : > { %v1116_v9 = vsel %vm280_vm1, %v277_v2, %v279_v7 }
  0xad   : > { %v328_v6 = vpop.permute.xlu0 %327 }
  0xae   : > { %v1109_v8 = vsel %vm331_vm0, %v328_v6, %v330_v3  ;;  %v357_v6 = vrot.slane %v1116_v9, 4 }
  0xaf   : > { %296 = vrot.lane.b32.xlu1 %v1106_v5, %s933_s29  ;;  %336 = vrot.lane.b32.xlu0 %v1109_v8, %s934_s16  ;;  %v320_v14 = vpop.permute.xlu1 %319  ;;  %v373_v46 = vrot.slane %v1109_v8, 4 }
  0xb0   : > { %v324_v26 = vsel %vm300_vm2, %v320_v14, 0.0 }
  0xb1   : > { %v308_v18 = vpop.permute.xlu0 %307  ;;  %v326_v32 = vsel %vm1129_vm3, 0.0, %v324_v26 }
  0xb2   : > { %v314_v34 = vsel %vm289_vm5, 0.0, %v308_v18  ;;  %v370_v42 = vrot.slane %v326_v32, 4 }
  0xb3   : > { %287 = vrot.lane.b32.xlu1 %v1116_v9, %s934_s16  ;;  %346 = vrot.lane.b32.xlu0 %v1109_v8, %s933_s29  ;;  %v318_v16 = vpop.permute.xlu1 %317  ;;  %v315_v43 = vsel %vm1146_vm7, 0.0, %v314_v34 }
  0xb4   : > { %v321_v28 = vsel %vm300_vm2, %v318_v16, %v320_v14  ;;  %v362_v52 = vrot.slane %v315_v43, 4  ;;  %v383_v58 = vsel %vm377_vm4, %v1080_v1, %v370_v42 }
  0xb5   : > { %v325_v36 = vsel %vm1138_vm6, 0.0, %v321_v28 }
  0xb6   : > { %v369_v47 = vrot.slane %v325_v36, 4 }
  0xb7   : > { %298 = vrot.lane.b32.xlu0 %v1116_v9, %s933_s29  ;;  %v310_v20 = vpop.permute.xlu1 %309 }
  0xb8   : > { %v311_v38 = vsel %vm289_vm5, %v308_v18, %v310_v20  ;;  %v382_v61 = vsel %vm377_vm4, %v1076_v0, %v369_v47 }
  0xb9   : > { %v316_v48 = vsel %vm1154_vm8, 0.0, %v311_v38 }
  0xba   : > { %v363_v55 = vrot.slane %v316_v48, 4 }
  0xbb   : > { %285 = vrot.lane.b32.xlu0 %v1106_v5, %s934_s16  ;;  %v273_v5 = vld [vmem:[%s1338_s1] sm:$0xf] }
  0xbf   : > { %389 = vperm.xlu0 %834, %v386_v12  }
 0x11d   : > { %v349_v22 = vpop.permute.xlu0 %348  ;;  %v339_v29 = vpop.permute.xlu1 %338 }
 0x11e   : > { %v353_v24 = vsel %vm300_vm2, %v349_v22, 0.0 }
 0x11f   : > { %v355_v25 = vsel %vm1129_vm3, 0.0, %v353_v24 }
 0x120   : > { %769 = vmatprep.subr.msk.mxu0 %vm377_vm4, %v355_v25 }
 0x121   : > { %v337_v30 = vpop.permute.xlu0 %336  ;;  %v297_v49 = vpop.permute.xlu1 %296 }
 0x122   : > { %v340_v31 = vsel %vm289_vm5, %v337_v30, %v339_v29  ;;  %v343_v35 = vsel %vm289_vm5, 0.0, %v337_v30  ;;  %v582_v30 = vld [vmem:[%s1341_s4] sm:$0xf] }
 0x123   : > { %v345_v40 = vsel %vm1154_vm8, 0.0, %v340_v31  ;;  %v344_v44 = vsel %vm1146_vm7, 0.0, %v343_v35 }
 0x124   : > { %v385_v51 = vsel %vm377_vm4, %v345_v40, %v374_v39  ;;  %v384_v54 = vsel %vm377_vm4, %v344_v44, %v373_v46 }
 0x125   : > { %v347_v41 = vpop.permute.xlu0 %346  ;;  %v288_v2 = vpop.permute.xlu1 %287 }
 0x126   : > { %v350_v45 = vsel %vm300_vm2, %v347_v41, %v349_v22 }
 0x127   : > { %v354_v50 = vsel %vm1138_vm6, 0.0, %v350_v45 }
 0x128   : > { %770 = vmatpush1.msk.msra.mxu0 %vm377_vm4, %v354_v50 }
 0x129   : > { %426 = vmatprep.subr.mxu0 %v385_v51  ;;  %v299_v53 = vpop.permute.xlu0 %298 }
 0x12a   : > { %v301_v56 = vsel %vm300_vm2, %v297_v49, %v299_v53  ;;  %v304_v57 = vsel %vm300_vm2, %v299_v53, 0.0  ;;  %427 = vmatpush1.msra.mxu0 %v384_v54 }
 0x12b   : > { %v305_v59 = vsel %vm1138_vm6, 0.0, %v301_v56  ;;  %v306_v60 = vsel %vm1129_vm3, 0.0, %v304_v57  ;;  %428 = vmatprep.subr.mxu0 %v383_v58 }
 0x12c   : > { %429 = vmatpush1.msra.mxu0 %v382_v61  ;;  %v381_v62 = vsel %vm377_vm4, %v306_v60, %v363_v55  ;;  %v380_v63 = vsel %vm377_vm4, %v305_v59, %v362_v52 }
 0x12d   : > { %430 = vmatprep.subr.mxu0 %v381_v62  ;;  %v286_v3 = vpop.permute.xlu0 %285 }
 0x12e   : > { %v290_v7 = vsel %vm289_vm5, %v286_v3, %v288_v2  ;;  %v293_v8 = vsel %vm289_vm5, 0.0, %v286_v3  ;;  %431 = vmatpush1.msra.mxu0 %v380_v63 }
 0x12f   : > { %v294_v10 = vsel %vm1146_vm7, 0.0, %v293_v8  ;;  %v295_v11 = vsel %vm1154_vm8, 0.0, %v290_v7 }
 0x130   : > { %v379_v12 = vsel %vm377_vm4, %v295_v11, %v357_v6  ;;  %v378_v13 = vsel %vm377_vm4, %v294_v10, %v356_v4 }
 0x131   : > { %432 = vmatprep.subr.mxu0 %v379_v12 }
 0x132   : > { %433 = vmatpush1.msra.mxu0 %v378_v13 }
 0x133   : > { %771 = vmatmul.mubr.msk.f32.vlgmr.msra.gmra.mxu0 %vm392_vm9, %v273_v5 }
 0x13a   : > { %v390_v9 = vpop.permute.xlu0 %389 }
 0x1f3   : > { %v468_v14 = vpop.f32.mrf.mxu0 }
 0x1f4   : > { %v469_v15 = vadd.f32 %v468_v14, %v390_v9 }
 0x1f5   : > { %v470_v16 = vpop.f32.mrf.mxu0 }
 0x1f6   : > { %v1201_v17 = vmax.f32 %v469_v15, 0.0  ;;  %v471_v18 = vadd.f32 %v470_v16, %v390_v9 }
 0x1f8   : > { %v1203_v19 = vmax.f32 %v471_v18, 0.0  ;;  %478 = vrot.lane.b32.xlu0 %v1201_v17, %s931_s12 }
 0x1fa   : > { %528 = vrot.lane.b32.xlu1 %v1203_v19, %s932_s14 }
 0x1fc   : > { %506 = vrot.lane.b32.xlu0 %v1201_v17, %s934_s16 }
 0x1fe   : > { %526 = vrot.lane.b32.xlu1 %v1201_v17, %s932_s14 }
 0x202   : > { %480 = vrot.lane.b32.xlu1 %v1203_v19, %s931_s12  ;;  %s690_s12 = sshll.u32 %s240_s15, 4  ;;  %s691_s12 = int_to_ptr.vmem [resolvable:$true] %s690_s12 }
 0x203   : > { %s864_s26 = scalar_lea.vmem %s691_s12, 128  ;;  %p871_p3 = scmp.lt.s32.totalorder %s691_s12, %s869_s17 }
 0x204   : > { %p865_p11 = scmp.ne.s32.totalorder %s691_s12, %s864_s26  ;;  %p872_p5 = scmp.lt.s32.totalorder %s870_s28, %s864_s26 }
 0x206   : > { %516 = vrot.lane.b32.xlu1 %v1201_v17, %s933_s29  ;;  %p866_p13 = pnand %p865_p11, %p1361_p12  ;;  %p873_p8 = por %p872_p5, %p871_p3 }
 0x208   : > { %p867_p1 = pneg %p866_p13 }
 0x20a   : > { %518 = vrot.lane.b32.xlu1 %v1203_v19, %s933_s29  ;;  %p874_p10 = pnand %p873_p8, %p867_p1 }
 0x20e   : > { %508 = vrot.lane.b32.xlu1 %v1203_v19, %s934_s16 }
 0x26a   : > { %v479_v22 = vpop.permute.xlu0 %478 }
 0x26b   : > { %v1225_v25 = vsel %vm280_vm1, 0.0, %v479_v22 }
 0x26c   : > { %v529_v20 = vpop.permute.xlu1 %528  ;;  %v554_v15 = vrot.slane %v1225_v25, 4 }
 0x26d   : > { %v532_v21 = vsel %vm331_vm0, %v529_v20, 0.0 }
 0x26e   : > { %546 = vrot.lane.b32.xlu0 %v532_v21, %s933_s29  ;;  %536 = vrot.lane.b32.xlu1 %v532_v21, %s934_s16  ;;  %v507_v34 = vpop.permute.xlu0 %506  ;;  %v571_v50 = vrot.slane %v532_v21, 4  ;;  %v475_v21 = vld [vmem:[%s1340_s3] sm:$0xf] }
 0x26f   : > { %v513_v45 = vsel %vm289_vm5, 0.0, %v507_v34 }
 0x270   : > { %v527_v24 = vpop.permute.xlu1 %526  ;;  %v514_v53 = vsel %vm1146_vm7, 0.0, %v513_v45 }
 0x271   : > { %v530_v26 = vsel %vm331_vm0, %v527_v24, %v529_v20  ;;  %v560_v63 = vrot.slane %v514_v53, 4 }
 0x272   : > { %496 = vrot.lane.b32.xlu1 %v1225_v25, %s933_s29  ;;  %534 = vrot.lane.b32.xlu0 %v530_v26, %s934_s16  ;;  %v570_v57 = vrot.slane %v530_v26, 4 }
 0x274   : > { %v481_v28 = vpop.permute.xlu1 %480 }
 0x275   : > { %v1232_v29 = vsel %vm280_vm1, %v479_v22, %v481_v28 }
 0x276   : > { %544 = vrot.lane.b32.xlu0 %v530_v26, %s933_s29  ;;  %488 = vrot.lane.b32.xlu1 %v1232_v29, %s934_s16  ;;  %v555_v27 = vrot.slane %v1232_v29, 4 }
 0x278   : > { %v517_v31 = vpop.permute.xlu1 %516 }
 0x27a   : > { %498 = vrot.lane.b32.xlu0 %v1232_v29, %s933_s29 }
 0x27c   : > { %v519_v32 = vpop.permute.xlu1 %518 }
 0x27d   : > { %v523_v40 = vsel %vm300_vm2, %v519_v32, 0.0  ;;  %v520_v41 = vsel %vm300_vm2, %v517_v31, %v519_v32 }
 0x27e   : > { %486 = vrot.lane.b32.xlu0 %v1225_v25, %s934_s16  ;;  %v525_v46 = vsel %vm1129_vm3, 0.0, %v523_v40  ;;  %v524_v48 = vsel %vm1138_vm6, 0.0, %v520_v41  ;;  %s688_s16 = scalar_lea.hbm %s1342_s5, %s781_s23 }
 0x27f   : > { %v567_v54 = vrot.slane %v525_v46, 4  ;;  %v566_v58 = vrot.slane %v524_v48, 4 }
 0x280   : > { %v509_v35 = vpop.permute.xlu1 %508 }
 0x281   : > { %v510_v49 = vsel %vm289_vm5, %v507_v34, %v509_v35  ;;  %v579_v8 = vsel %vm377_vm4, %v1203_v19, %v567_v54  ;;  %v578_v12 = vsel %vm377_vm4, %v1201_v17, %v566_v58 }
 0x282   : > { %585 = vperm.xlu0 %834, %v582_v30   ;;  %v515_v59 = vsel %vm1154_vm8, 0.0, %v510_v49 }
 0x283   : > { %v561_v4 = vrot.slane %v515_v59, 4 }
 0x2e0   : > { %v547_v36 = vpop.permute.xlu0 %546  ;;  %v537_v42 = vpop.permute.xlu1 %536 }
 0x2e1   : > { %v551_v38 = vsel %vm300_vm2, %v547_v36, 0.0 }
 0x2e2   : > { %v553_v39 = vsel %vm1129_vm3, 0.0, %v551_v38 }
 0x2e3   : > { %772 = vmatprep.subr.msk.mxu1 %vm377_vm4, %v553_v39 }
 0x2e4   : > { %v535_v43 = vpop.permute.xlu0 %534  ;;  %v497_v60 = vpop.permute.xlu1 %496 }
 0x2e5   : > { %v538_v44 = vsel %vm289_vm5, %v535_v43, %v537_v42  ;;  %v541_v47 = vsel %vm289_vm5, 0.0, %v535_v43 }
 0x2e6   : > { %v543_v51 = vsel %vm1154_vm8, 0.0, %v538_v44  ;;  %v542_v55 = vsel %vm1146_vm7, 0.0, %v541_v47 }
 0x2e7   : > { %v581_v62 = vsel %vm377_vm4, %v543_v51, %v571_v50  ;;  %v580_v3 = vsel %vm377_vm4, %v542_v55, %v570_v57 }
 0x2e8   : > { %v545_v52 = vpop.permute.xlu0 %544  ;;  %v489_v9 = vpop.permute.xlu1 %488 }
 0x2e9   : > { %v548_v56 = vsel %vm300_vm2, %v545_v52, %v547_v36 }
 0x2ea   : > { %v552_v61 = vsel %vm1138_vm6, 0.0, %v548_v56 }
 0x2eb   : > { %773 = vmatpush1.msk.msra.mxu1 %vm377_vm4, %v552_v61 }
 0x2ec   : > { %v499_v2 = vpop.permute.xlu0 %498  ;;  %621 = vmatprep.subr.mxu1 %v581_v62 }
 0x2ed   : > { %v500_v6 = vsel %vm300_vm2, %v497_v60, %v499_v2  ;;  %v503_v7 = vsel %vm300_vm2, %v499_v2, 0.0  ;;  %622 = vmatpush1.msra.mxu1 %v580_v3 }
 0x2ee   : > { %v504_v10 = vsel %vm1138_vm6, 0.0, %v500_v6  ;;  %v505_v11 = vsel %vm1129_vm3, 0.0, %v503_v7  ;;  %623 = vmatprep.subr.mxu1 %v579_v8 }
 0x2ef   : > { %624 = vmatpush1.msra.mxu1 %v578_v12  ;;  %v577_v13 = vsel %vm377_vm4, %v505_v11, %v561_v4  ;;  %v576_v5 = vsel %vm377_vm4, %v504_v10, %v560_v63 }
 0x2f0   : > { %v487_v14 = vpop.permute.xlu0 %486  ;;  %625 = vmatprep.subr.mxu1 %v577_v13 }
 0x2f1   : > { %v490_v16 = vsel %vm289_vm5, %v487_v14, %v489_v9  ;;  %v493_v23 = vsel %vm289_vm5, 0.0, %v487_v14  ;;  %626 = vmatpush1.msra.mxu1 %v576_v5 }
 0x2f2   : > { %v494_v17 = vsel %vm1146_vm7, 0.0, %v493_v23  ;;  %v495_v18 = vsel %vm1154_vm8, 0.0, %v490_v16 }
 0x2f3   : > { %v575_v19 = vsel %vm377_vm4, %v495_v18, %v555_v27  ;;  %v574_v20 = vsel %vm377_vm4, %v494_v17, %v554_v15 }
 0x2f4   : > { %627 = vmatprep.subr.mxu1 %v575_v19 }
 0x2f5   : > { %628 = vmatpush1.msra.mxu1 %v574_v20 }
 0x2f6   : > { %774 = vmatmul.mubr.msk.f32.vlgmr.msra.gmra.mxu1 %vm392_vm9, %v475_v21 }
 0x2fd   : > { %v586_v22 = vpop.permute.xlu0 %585 }
 0x3b6   : > { %v663_v24 = vpop.f32.mrf.mxu1 }
 0x3b7   : > { %v664_v33 = vadd.f32 %v663_v24, %v586_v22 }
 0x3b8   : > { %v665_v25 = vpop.f32.mrf.mxu1 }
 0x3b9   : > { %v666_v37 = vadd.f32 %v665_v25, %v586_v22  ;;  %v668_v26 = vadd.f32 %v664_v33, %v1076_v0 }
 0x3bb   : > { %v669_v28 = vadd.f32 %v666_v37, %v1080_v1 }
 0x3bd   : > { %v672_v29 = vcombine.low %v668_v26, %v669_v28 }
 0x3bf   : > { %674 = vst [vmem:[%s240_s15] sm:$0xff] %v672_v29 }
 0x3c0   : > { %877 = shalt.err (!%p874_p10)
}
 0x3c1   : > { %s878_s8 = scalar_lea.hbm %s688_s16, 128  ;;  %s882_s9 = scalar_lea.hbm %s1342_s5, 256 }
 0x3c2   : > { %p879_p2 = scmp.ne.s32.totalorder %s688_s16, %s878_s8  ;;  %p883_p7 = scmp.lt.s32.totalorder %s688_s16, %s1342_s5 }
 0x3c3   : > { %p884_p0 = scmp.lt.s32.totalorder %s882_s9, %s878_s8 }
 0x3c4   : > { %p880_p4 = pnand %p879_p2, %p1361_p12 }
 0x3c5   : > { %p885_p6 = por %p884_p0, %p883_p7 }
 0x3c6   : > { %p881_p9 = pneg %p880_p4 }
 0x3c8   : > { %p886_p11 = pnand %p885_p6, %p881_p9 }
 0x3ca   : > { %889 = shalt.err (!%p886_p11)
}
 0x3cb   : > { %784 = dma.vmem_to_hbm [thread:$0]  (%p1361_p12), %s691_s12, 128, %s688_s16, %s676_s25  }
 0x3cc PF: > { %s702_s23 = sand.u32 1, %s916_s18   ;;  %p1362_p13 = scmp.ne.s32.totalorder %s1348_s6, 0 }
 0x3cd   : > { %p1363_p1 = scmp.ge.s32.totalorder %s928_s21, 2  ;;  %s703_s15 = scalar_lea.sflag [#allocation4], %s702_s23 }
 0x3cf   : > { %p791_p3 = pnand %p1363_p1, %p1362_p13 }
 0x3d1   : > { %p792_p5 = pneg %p791_p3 }
 0x3d3   : > { %911 = dma.done.wait (%p792_p5), %s703_s15, 128  }
 0x3d4   : > { %913 = vsyncadd (%p792_p5), %s703_s15, 4294967168  ;;  %p18_p8 = scmp.ge.s32.totalorder %s993_s24, 4   ;;  %s1364_s18 = smov %s920_s19 }
 0x3d5   : > { %s1365_s19 = smov %s924_s20  ;;  %s1366_s20 = smov %s1005_s27 }
 0x3d6   : > { %s1367_s21 = smov %s993_s24  ;;  %20 = sbr.rel (!%p18_p8) target bundleno = 5 (0x5), region = 85 }
 0x3db   :  { %708 = vsyncpa [#allocation3], 1 }
 0x3dc   :  { %710 = vsyncpa [#allocation3 + $0x1], 1 }
 0x3dd   :  { %711 = vsyncpa [#allocation4], 1 }
 0x3de   :  { %713 = vsyncpa [#allocation4 + $0x1], 1 }

</bundles_post_ra>
